<compile_context>
chip_gen: v7x
topology: tpu7x:2x2x1
jax: 0.10.0
libtpu: 0.0.40
codegen_flags: <defaults>
</compile_context>

<pallas_src>
import functools

import jax
import jax.numpy as jnp
from jax.experimental import pallas as pl
from jax.experimental.pallas import tpu as pltpu

LANE = 128
BLOCK_BYTES = 2 * 1024 * 1024  # target bytes per input, per pipeline buffer
VMEM_LIMIT = 32 * 1024 * 1024  # safe on v5e/v6e (128 MiB phys) and v7x (64 MiB)


def _round_up(a, b):
    return (a + b - 1) // b * b


def _sublane_align(*dtypes):
    # f32 -> 8, bf16/f16 -> 16, (u)int8/fp8 -> 32 sublane tiling.
    return max(8, max(32 // jnp.dtype(d).itemsize for d in dtypes))


def _dice_kernel(x_ref, t_ref, o_ref, acc_ref, *,
                 smooth, tm, need_mask, full_rows, rem):
    i = pl.program_id(0)
    last = pl.num_programs(0) - 1

    @pl.when(i == 0)
    def _init():
        acc_ref[...] = jnp.zeros_like(acc_ref)

    def accumulate(masked):
        p = jax.nn.sigmoid(x_ref[...].astype(jnp.float32))
        t = t_ref[...].astype(jnp.float32)
        if masked:
            # Row-granular validity: rows strictly before `full_rows` are fully
            # valid; row `full_rows` is the (optional) ragged row with `rem`
            # valid lanes; anything past that (including stale VMEM rows beyond
            # the array end) is zeroed.  Row indices stay well inside int32.
            row = jax.lax.broadcasted_iota(jnp.int32, (tm, LANE), 0)
            col = jax.lax.broadcasted_iota(jnp.int32, (tm, LANE), 1)
            grow = i * tm + row
            valid = (grow < full_rows) | ((grow == full_rows) & (col < rem))
            p = jnp.where(valid, p, 0.0)
            t = jnp.where(valid, t, 0.0)

        # Reduce the (tm, 128) block to one (8, 128) vreg per quantity using
        # only VPU adds (tile-aligned reshape is layout-free); cross-lane
        # reductions are deferred to the epilogue.
        def block_partial(v):
            return jnp.sum(v.reshape(tm // 8, 8, LANE), axis=0)

        acc_ref[0] += block_partial(p * t)  # intersection
        acc_ref[1] += block_partial(p + t)  # sum(p) + sum(t)

    if need_mask:
        # Steady-state steps: no masking work at all.
        @pl.when(i != last)
        def _steady():
            accumulate(masked=False)

        # Only the final step can touch invalid elements.
        @pl.when(i == last)
        def _tail():
            accumulate(masked=True)
    else:
        accumulate(masked=False)

    @pl.when(i == last)
    def _finalize():
        inter = jnp.sum(acc_ref[0])
        denom = jnp.sum(acc_ref[1])
        dice = (2.0 * inter + smooth) / (denom + smooth)
        o_ref[0, 0] = 1.0 - dice


def dice_loss(inputs, targets, smooth=1.0):
    x = inputs.reshape(-1)
    t = targets.reshape(-1)
    if t.dtype == jnp.bool_:
        # Stream targets as 1 B/elem; the f32 cast happens in-kernel.
        t = t.astype(jnp.uint8)
    n = x.shape[0]

    rows = pl.cdiv(n, LANE)
    if n % LANE:
        # Rare path (numel not a multiple of 128): pad so the 2-D reshape is
        # legal; the in-kernel tail mask ignores the padded lanes.
        pad = rows * LANE - n
        x = jnp.pad(x, (0, pad))
        t = jnp.pad(t, (0, pad))

    x2 = x.reshape(rows, LANE)
    t2 = t.reshape(rows, LANE)

    # Byte-constant tiles: ~BLOCK_BYTES per input per buffer, whatever dtype.
    itemsize = max(jnp.dtype(x2.dtype).itemsize, jnp.dtype(t2.dtype).itemsize)
    align = _sublane_align(x2.dtype, t2.dtype)
    tm_target = max(align, BLOCK_BYTES // (LANE * itemsize))
    tm = min(_round_up(tm_target, align), _round_up(rows, align))
    grid = (pl.cdiv(rows, tm),)

    # Mask only when the grid's block coverage exceeds the true element count;
    # in that case all invalid elements live in the final block.
    need_mask = (grid[0] * tm * LANE) != n

    kernel = functools.partial(
        _dice_kernel,
        smooth=float(smooth),
        tm=tm,
        need_mask=need_mask,
        full_rows=n // LANE,
        rem=n % LANE,
    )

    out = pl.pallas_call(
        kernel,
        out_shape=jax.ShapeDtypeStruct((1, 1), jnp.float32),
        grid_spec=pltpu.PrefetchScalarGridSpec(
            num_scalar_prefetch=0,
            grid=grid,
            in_specs=[
                pl.BlockSpec((tm, LANE), lambda i: (i, 0)),
                pl.BlockSpec((tm, LANE), lambda i: (i, 0)),
            ],
            out_specs=pl.BlockSpec(
                (1, 1), lambda i: (0, 0), memory_space=pltpu.SMEM
            ),
            scratch_shapes=[pltpu.VMEM((2, 8, LANE), jnp.float32)],
        ),
        compiler_params=pltpu.CompilerParams(
            dimension_semantics=("arbitrary",),
            vmem_limit_bytes=VMEM_LIMIT,
        ),
    )(x2, t2)
    return out[0, 0]


def _reference_dice_loss(inputs, targets, smooth=1.0):
    p = jax.nn.sigmoid(inputs.astype(jnp.float32)).reshape(-1)
    t = targets.astype(jnp.float32).reshape(-1)
    inter = jnp.sum(p * t)
    dice = (2.0 * inter + smooth) / (jnp.sum(p) + jnp.sum(t) + smooth)
    return 1.0 - dice


if __name__ == "__main__":
    key = jax.random.PRNGKey(0)
    k1, k2 = jax.random.split(key)

    # Shapes consistent with a segmentation logit map: (N, C, H, W).
    x = jax.random.normal(k1, (2, 4, 16, 16), dtype=jnp.float32)
    tgt = (jax.random.uniform(k2, (2, 4, 16, 16)) > 0.5).astype(jnp.float32)

    loss = dice_loss(x, tgt, smooth=1.0)
    jax.block_until_ready(loss)

    ref = _reference_dice_loss(x, tgt, smooth=1.0)
    assert jnp.allclose(loss, ref, atol=1e-5, rtol=1e-5), (loss, ref)

    print("KERNEL_OK")
</pallas_src>

<mosaic_0001>
module attributes {stable_mosaic.version = 11 : i64} {
  func.func @_dice_kernel(%arg0: i32, %arg1: memref<16x128xf32, #tpu.memory_space<vmem>>, %arg2: memref<16x128xf32, #tpu.memory_space<vmem>>, %arg3: memref<1x1xf32, #tpu.memory_space<smem>>, %arg4: memref<2x8x128xf32, #tpu.memory_space<vmem>>) attributes {dimension_semantics = [#tpu.dimension_semantics<arbitrary>], iteration_bounds = array<i64: 1>, scalar_prefetch = 0 : i64, scratch_operands = 1 : i64, tpu.core_type = #tpu.core_type<tc>, window_params = [{transform_indices = @transform_0, window_bounds = array<i64: 16, 128>}, {transform_indices = @transform_1, window_bounds = array<i64: 16, 128>}, {transform_indices = @transform_2, window_bounds = array<i64: 1, 1>}]} {
    %c0_i32 = arith.constant 0 : i32
    %0 = arith.cmpi eq, %arg0, %c0_i32 : i32
    %1 = arith.extui %0 : i1 to i32
    %c0_i32_0 = arith.constant 0 : i32
    %2 = arith.cmpi ne, %1, %c0_i32_0 : i32
    scf.if %2 {
      %cst_19 = arith.constant 0.000000e+00 : f32
      %31 = vector.broadcast %cst_19 : f32 to vector<2x8x128xf32>
      %c0_20 = arith.constant 0 : index
      %c0_21 = arith.constant 0 : index
      %c0_22 = arith.constant 0 : index
      %32 = vector.load %arg4[%c0_20, %c0_21, %c0_22] : memref<2x8x128xf32, #tpu.memory_space<vmem>>, vector<2x8x128xf32>
      tpu.vector_store %arg4[%c0_20, %c0_21, %c0_22], %31 {strides = array<i32>} : memref<2x8x128xf32, #tpu.memory_space<vmem>>, vector<2x8x128xf32>,
    } else {
    }
    %c0 = arith.constant 0 : index
    %c0_1 = arith.constant 0 : index
    %3 = vector.load %arg1[%c0, %c0_1] : memref<16x128xf32, #tpu.memory_space<vmem>>, vector<16x128xf32>
    %4 = arith.negf %3 : vector<16x128xf32>
    %5 = math.exp %4 : vector<16x128xf32>
    %cst = arith.constant 1.000000e+00 : f32
    %6 = vector.broadcast %cst : f32 to vector<16x128xf32>
    %7 = arith.addf %6, %5 : vector<16x128xf32>
    %8 = arith.divf %6, %7 : vector<16x128xf32>
    %c0_2 = arith.constant 0 : index
    %c0_3 = arith.constant 0 : index
    %9 = vector.load %arg2[%c0_2, %c0_3] : memref<16x128xf32, #tpu.memory_space<vmem>>, vector<16x128xf32>
    %c0_4 = arith.constant 0 : index
    %c0_5 = arith.constant 0 : index
    %c0_6 = arith.constant 0 : index
    %10 = vector.load %arg4[%c0_4, %c0_5, %c0_6] : memref<2x8x128xf32, #tpu.memory_space<vmem>>, vector<1x8x128xf32>
    %11 = vector.shape_cast %10 : vector<1x8x128xf32> to vector<8x128xf32>
    %12 = arith.mulf %8, %9 : vector<16x128xf32>
    %13 = vector.shape_cast %12 : vector<16x128xf32> to vector<2x8x128xf32>
    %cst_7 = arith.constant dense<0.000000e+00> : vector<8x128xf32>
    %14 = vector.multi_reduction <add>, %13, %cst_7 [0] : vector<2x8x128xf32> to vector<8x128xf32>
    %15 = arith.addf %11, %14 : vector<8x128xf32>
    %c0_8 = arith.constant 0 : index
    %c0_9 = arith.constant 0 : index
    %c0_10 = arith.constant 0 : index
    %16 = vector.load %arg4[%c0_8, %c0_9, %c0_10] : memref<2x8x128xf32, #tpu.memory_space<vmem>>, vector<1x8x128xf32>
    %17 = vector.shape_cast %16 : vector<1x8x128xf32> to vector<8x128xf32>
    %18 = vector.shape_cast %15 : vector<8x128xf32> to vector<1x8x128xf32>
    tpu.vector_store %arg4[%c0_8, %c0_9, %c0_10], %18 {strides = array<i32>} : memref<2x8x128xf32, #tpu.memory_space<vmem>>, vector<1x8x128xf32>,
    %c1 = arith.constant 1 : index
    %c0_11 = arith.constant 0 : index
    %c0_12 = arith.constant 0 : index
    %19 = vector.load %arg4[%c1, %c0_11, %c0_12] : memref<2x8x128xf32, #tpu.memory_space<vmem>>, vector<1x8x128xf32>
    %20 = vector.shape_cast %19 : vector<1x8x128xf32> to vector<8x128xf32>
    %21 = arith.addf %8, %9 : vector<16x128xf32>
    %22 = vector.shape_cast %21 : vector<16x128xf32> to vector<2x8x128xf32>
    %cst_13 = arith.constant dense<0.000000e+00> : vector<8x128xf32>
    %23 = vector.multi_reduction <add>, %22, %cst_13 [0] : vector<2x8x128xf32> to vector<8x128xf32>
    %24 = arith.addf %20, %23 : vector<8x128xf32>
    %c1_14 = arith.constant 1 : index
    %c0_15 = arith.constant 0 : index
    %c0_16 = arith.constant 0 : index
    %25 = vector.load %arg4[%c1_14, %c0_15, %c0_16] : memref<2x8x128xf32, #tpu.memory_space<vmem>>, vector<1x8x128xf32>
    %26 = vector.shape_cast %25 : vector<1x8x128xf32> to vector<8x128xf32>
    %27 = vector.shape_cast %24 : vector<8x128xf32> to vector<1x8x128xf32>
    tpu.vector_store %arg4[%c1_14, %c0_15, %c0_16], %27 {strides = array<i32>} : memref<2x8x128xf32, #tpu.memory_space<vmem>>, vector<1x8x128xf32>,
    %c0_i32_17 = arith.constant 0 : i32
    %28 = arith.cmpi eq, %arg0, %c0_i32_17 : i32
    %29 = arith.extui %28 : i1 to i32
    %c0_i32_18 = arith.constant 0 : i32
    %30 = arith.cmpi ne, %29, %c0_i32_18 : i32
    scf.if %30 {
      %c0_19 = arith.constant 0 : index
      %c0_20 = arith.constant 0 : index
      %c0_21 = arith.constant 0 : index
      %31 = vector.load %arg4[%c0_19, %c0_20, %c0_21] : memref<2x8x128xf32, #tpu.memory_space<vmem>>, vector<1x8x128xf32>
      %32 = vector.shape_cast %31 : vector<1x8x128xf32> to vector<8x128xf32>
      %33 = vector.shape_cast %32 : vector<8x128xf32> to vector<1x8x128xf32>
      %cst_22 = arith.constant dense<0.000000e+00> : vector<1xf32>
      %34 = vector.multi_reduction <add>, %33, %cst_22 [1, 2] : vector<1x8x128xf32> to vector<1xf32>
      %35 = vector.shape_cast %34 : vector<1xf32> to vector<1x1x1xf32>
      %36 = vector.extract %35[0, 0, 0] : f32 from vector<1x1x1xf32>
      %c1_23 = arith.constant 1 : index
      %c0_24 = arith.constant 0 : index
      %c0_25 = arith.constant 0 : index
      %37 = vector.load %arg4[%c1_23, %c0_24, %c0_25] : memref<2x8x128xf32, #tpu.memory_space<vmem>>, vector<1x8x128xf32>
      %38 = vector.shape_cast %37 : vector<1x8x128xf32> to vector<8x128xf32>
      %39 = vector.shape_cast %38 : vector<8x128xf32> to vector<1x8x128xf32>
      %cst_26 = arith.constant dense<0.000000e+00> : vector<1xf32>
      %40 = vector.multi_reduction <add>, %39, %cst_26 [1, 2] : vector<1x8x128xf32> to vector<1xf32>
      %41 = vector.shape_cast %40 : vector<1xf32> to vector<1x1x1xf32>
      %42 = vector.extract %41[0, 0, 0] : f32 from vector<1x1x1xf32>
      %cst_27 = arith.constant 2.000000e+00 : f32
      %43 = arith.mulf %cst_27, %36 : f32
      %cst_28 = arith.constant 1.000000e+00 : f32
      %44 = arith.addf %43, %cst_28 : f32
      %cst_29 = arith.constant 1.000000e+00 : f32
      %45 = arith.addf %42, %cst_29 : f32
      %46 = arith.divf %44, %45 : f32
      %cst_30 = arith.constant 1.000000e+00 : f32
      %47 = arith.subf %cst_30, %46 : f32
      %c0_31 = arith.constant 0 : index
      %c0_32 = arith.constant 0 : index
      %48 = memref.load %arg3[%c0_31, %c0_32] : memref<1x1xf32, #tpu.memory_space<smem>>
      memref.store %47, %arg3[%c0_31, %c0_32] : memref<1x1xf32, #tpu.memory_space<smem>>
    } else {
    }
    return
  }
  func.func @transform_0(%arg0: i32) -> (i32, i32) {
    %c0_i32 = arith.constant 0 : i32
    %c0_i32_0 = arith.constant 0 : i32
    return %arg0, %c0_i32 : i32, i32
  }
  func.func @transform_1(%arg0: i32) -> (i32, i32) {
    %c0_i32 = arith.constant 0 : i32
    %c0_i32_0 = arith.constant 0 : i32
    return %arg0, %c0_i32 : i32, i32
  }
  func.func @transform_2(%arg0: i32) -> (i32, i32) {
    %c0_i32 = arith.constant 0 : i32
    %c0_i32_0 = arith.constant 0 : i32
    %c0_i32_1 = arith.constant 0 : i32
    return %c0_i32, %c0_i32_0 : i32, i32
  }
}

</mosaic_0001>

<bundles_post_ra>
// kernel: tpu_custom_call.1
= control target key start
LH: loop header
LB: loop body
LE: loop exit
PB: predicated region body
PF: predicated region fallthrough
CT: control target
= control target key end

     0   :  { %7 = vsyncpa [#allocation4], 0  ;;  %s262_s0 = inlined_call_operand.hbm [shape: f32[16,128], index: 0, kind: input, shape index: {}]   ;;  %s263_s1 = inlined_call_operand.hbm [shape: f32[16,128], index: 1, kind: input, shape index: {}]   ;;  %s264_s2 = inlined_call_operand.hbm [shape: f32[1,1], index: 2, kind: output, shape index: {}]  }
   0x1   :  { %8 = vsyncpa [#allocation7], 0 }
   0x2   :  { %9 = vsyncpa [#allocation5], 0  ;;  %s206_s9 = smov [#allocation3]   ;;  %s146_s13 = scalar_lea.hbm %s262_s0, 256 }
   0x3   :  { %s15_s10 = sshll.u32 %s206_s9, 4  ;;  %p147_p0 = scmp.ne.s32.totalorder %s262_s0, %s146_s13  ;;  %s16_s10 = int_to_ptr.vmem [resolvable:$true] %s15_s10 }
   0x4   :  { %p150_p1 = scmp.lt.u32.totalorder %s146_s13, %s262_s0 }
   0x6   :  { %p152_p2 = pnand %p150_p1, %p147_p0 }
   0x8   :  { %155 = shalt.err (!%p152_p2)
}
   0x9   :  { %s156_s18 = scalar_lea.vmem %s16_s10, 256  ;;  %p161_p4 = scmp.lt.s32.totalorder %s16_s10, %s16_s10 }
   0xa   :  { %p157_p3 = scmp.ne.s32.totalorder %s16_s10, %s156_s18  ;;  %p162_p5 = scmp.lt.s32.totalorder %s156_s18, %s156_s18 }
   0xc   :  { %p163_p6 = por %p162_p5, %p161_p4 }
   0xe   :  { %p164_p7 = pnand %p163_p6, %p157_p3 }
  0x10   :  { %167 = shalt.err (!%p164_p7)
}
  0x11   :  { %s207_s19 = smov 128   ;;  %s208_s20 = smov 8  }
  0x12   :  { %21 = dma.hbm_to_vmem [thread:$0]  %s262_s0, 256, %s16_s10, [#allocation4], %s207_s19, %s207_s19, %s208_s20  }
  0x13   :  { %s209_s23 = smov [#allocation6]   ;;  %s168_s27 = scalar_lea.hbm %s263_s1, 256 }
  0x14   :  { %s27_s24 = sshll.u32 %s209_s23, 4  ;;  %p169_p8 = scmp.ne.s32.totalorder %s263_s1, %s168_s27  ;;  %s28_s24 = int_to_ptr.vmem [resolvable:$true] %s27_s24 }
  0x15   :  { %p172_p9 = scmp.lt.u32.totalorder %s168_s27, %s263_s1 }
  0x17   :  { %p174_p10 = pnand %p172_p9, %p169_p8 }
  0x19   :  { %177 = shalt.err (!%p174_p10)
}
  0x1a   :  { %s178_s4 = scalar_lea.vmem %s28_s24, 256  ;;  %p183_p12 = scmp.lt.s32.totalorder %s28_s24, %s28_s24 }
  0x1b   :  { %p179_p11 = scmp.ne.s32.totalorder %s28_s24, %s178_s4  ;;  %p184_p13 = scmp.lt.s32.totalorder %s178_s4, %s178_s4 }
  0x1d   :  { %p185_p0 = por %p184_p13, %p183_p12 }
  0x1f   :  { %p186_p1 = pnand %p185_p0, %p179_p11 }
  0x21   :  { %189 = shalt.err (!%p186_p1)
}
  0x22   :  { %33 = dma.hbm_to_vmem [thread:$0]  %s263_s1, 256, %s28_s24, [#allocation7], %s207_s19, %s207_s19, %s208_s20  }
  0x23   :  { %200 = dma.done.wait [#allocation4], 256  }
  0x24   :  { %201 = vsyncadd [#allocation4], 4294967040 }
  0x25   :  { %202 = dma.done.wait [#allocation7], 256  }
  0x26   :  { %203 = vsyncadd [#allocation7], 4294967040  ;;  %v46_v0 = vld [vmem:[#allocation3] sm:$0xff]  ;;  %v47_v1 = vld [vmem:[#allocation3 + $0x8] sm:$0xff]  ;;  %s190_s15 = scalar_lea.hbm %s264_s2, 16 }
  0x27   :  { %v123_v2 = vmul.f32 -1.442695, %v46_v0  ;;  %v124_v3 = vmul.f32 -1.442695, %v47_v1  ;;  %v60_v8 = vld [vmem:[#allocation6] sm:$0xff]  ;;  %v61_v9 = vld [vmem:[#allocation6 + $0x8] sm:$0xff]  ;;  %p191_p2 = scmp.ne.s32.totalorder %s264_s2, %s190_s15  ;;  %p194_p3 = scmp.lt.u32.totalorder %s190_s15, %s264_s2 }
  0x29   :  { %136 = vpow2.f32 %v123_v2  ;;  %p196_p4 = pnand %p194_p3, %p191_p2 }
  0x2a   :  { %138 = vpow2.f32 %v124_v3 }
  0x33   :  { %v137_v4 = vpop.eup %136 }
  0x34   :  { %v139_v5 = vpop.eup %138  ;;  %v54_v6 = vadd.f32 1.0, %v137_v4 }
  0x35   :  { %v55_v7 = vadd.f32 1.0, %v139_v5 }
  0x36   :  { %140 = vrcp.f32 %v54_v6 }
  0x37   :  { %142 = vrcp.f32 %v55_v7 }
  0x40   :  { %v141_v10 = vpop.eup %140 }
  0x41   :  { %v143_v11 = vpop.eup %142  ;;  %v63_v12 = vmul.f32 %v141_v10, %v60_v8  ;;  %v70_v14 = vadd.f32 %v141_v10, %v60_v8 }
  0x42   :  { %v64_v13 = vmul.f32 %v143_v11, %v61_v9  ;;  %v71_v15 = vadd.f32 %v143_v11, %v61_v9 }
  0x44   :  { %v65_v16 = vadd.f32 %v64_v13, %v63_v12  ;;  %v72_v17 = vadd.f32 %v71_v15, %v70_v14 }
  0x46   :  { %79 = vadd.xlane.f32.xlu0 %v65_v16 }
  0x4a   :  { %89 = vadd.xlane.f32.xlu0 %v72_v17 }
  0xd3   :  { %v80_v18 = vpop.xlane.xlu0 %79 }
  0xd4   :  { %v81_v19 = vrot.slane %v80_v18, 4 }
  0xd6   :  { %v82_v20 = vadd.f32 %v81_v19, %v80_v18 }
  0xd7   :  { %v90_v21 = vpop.xlane.xlu0 %89 }
  0xd8   :  { %v83_v22 = vrot.slane %v82_v20, 2  ;;  %v91_v23 = vrot.slane %v90_v21, 4 }
  0xda   :  { %v92_v24 = vadd.f32 %v91_v23, %v90_v21  ;;  %v84_v25 = vadd.f32 %v83_v22, %v82_v20 }
  0xdc   :  { %v93_v26 = vrot.slane %v92_v24, 2  ;;  %v85_v27 = vrot.slane %v84_v25, 1 }
  0xde   :  { %v94_v28 = vadd.f32 %v93_v26, %v92_v24  ;;  %v86_v29 = vadd.f32 %v85_v27, %v84_v25 }
  0xe0   :  { %125 = vpush %v86_v29  ;;  %v95_v30 = vrot.slane %v94_v28, 1 }
  0xe2   :  { %v96_v31 = vadd.f32 %v95_v30, %v94_v28 }
  0xe4   :  { %127 = vpush %v96_v31 }
 0x111   :  { %s126_s1 = spop %125 }
 0x112   :  { %s98_s8 = smul.f32 2.0, %s126_s1 }
 0x114   :  { %s99_s9 = sadd.f32 1.0, %s98_s8 }
 0x115   :  { %s128_s6 = spop %127 }
 0x116   :  { %s100_s7 = sadd.f32 1.0, %s128_s6 }
 0x118   :  { %v101_v32 = vstv %s100_s7 }
 0x119   :  { %144 = vrcp.f32 %v101_v32 }
 0x123   :  { %v145_v33 = vpop.eup %144 }
 0x124   :  { %129 = vpush %v145_v33 }
 0x155   :  { %s130_s10 = spop %129 }
 0x156   :  { %s104_s11 = smul.f32 %s130_s10, %s99_s9 }
 0x158   :  { %s105_s12 = ssub.f32 1.0, %s104_s11 }
 0x15a   :  { %107 = sst [smem:[#allocation8]] %s105_s12 }
 0x15b   :  { %199 = shalt.err (!%p196_p4)
}
 0x15c   :  { %s210_s20 = smov [#allocation8]  }
 0x15d   :  { %115 = dma.smem_to_hbm %s210_s20, 16, %s264_s2, [#allocation5]  }
 0x15e   :  { %204 = dma.done.wait [#allocation5], 16  }
 0x15f   :  { %205 = vsyncadd [#allocation5], 4294967280 }
 0x160   :  { %119 = sfence }
 0x161   :  { %120 = vsyncpa [#allocation4], 1 }
 0x162   :  { %121 = vsyncpa [#allocation7], 1 }
 0x163   :  { %122 = vsyncpa [#allocation5], 1 }

</bundles_post_ra>
